<compile_context>
chip_gen: v6e
topology: v6e:2x2x1
jax: 0.10.0
libtpu: 0.0.40
codegen_flags: <defaults>
</compile_context>

<pallas_src>
import math

import jax
import jax.numpy as jnp
from jax.experimental import pallas as pl
from jax.experimental.pallas import tpu as pltpu


# ----------------------------------------------------------------------------
# Fused attention-pooling kernel: one grid step handles Bt batch elements.
# ----------------------------------------------------------------------------
def attention_pooling_kernel(x_ref, wq_ref, bq_ref, wkv_ref, bkv_ref,
                             pos_kv_ref, g_ref, gt_ref, out_ref):
    Bt, T, E = x_ref.shape
    H = g_ref.shape[1]
    mm_dtype = wkv_ref.dtype                       # bf16 MXU operand dtype

    x = x_ref[...]                                 # (Bt, T, E)  f32
    x2d = x.reshape(Bt * T, E)

    # Fused K/V projection of all Bt*T tokens: one bf16 MXU push, f32 acc.
    x_kv = jnp.dot(x2d.astype(mm_dtype), wkv_ref[...],
                   preferred_element_type=jnp.float32) + bkv_ref[...]   # (Bt*T, 2E)
    x_kv3 = x_kv.reshape(Bt, T, 2 * E)

    # Class-token K/V by linearity:  mean(x @ Wkv + bkv, axis=T) + pos @ Wkv.
    cls_kv = jnp.mean(x_kv3, axis=1) + pos_kv_ref[...]                  # (Bt, 2E)

    # Class-token Q (1/sqrt(d) scale and pos@Wq + bq folded into wq/bq refs).
    mean_x = jnp.mean(x, axis=1)                                        # (Bt, E)
    q = jnp.dot(mean_x.astype(mm_dtype), wq_ref[...],
                preferred_element_type=jnp.float32) + bq_ref[...]       # (Bt, E)

    k_cls, v_cls = cls_kv[:, :E], cls_kv[:, E:]                         # (Bt, E)
    k_x, v_x = x_kv3[:, :, :E], x_kv3[:, :, E:]                         # (Bt, T, E)

    G, GT = g_ref[...], gt_ref[...]                                     # (E,H),(H,E)

    # Per-head scores, lane-dense: elementwise q*k on the E lanes, then a
    # head-grouping matmul with the one-hot matrix G (sum within each head).
    s_cls = jnp.dot(q * k_cls, G, preferred_element_type=jnp.float32)   # (Bt, H)
    qk = (q[:, None, :] * k_x).reshape(Bt * T, E)                       # (Bt*T, E)
    s_x = jnp.dot(qk, G,
                  preferred_element_type=jnp.float32).reshape(Bt, T, H)

    # Softmax over S = {class token} ∪ {T tokens}; class token kept as a
    # separate term, so no (T+1)-long concat is ever materialized.
    m = jnp.maximum(jnp.max(s_x, axis=1), s_cls)                        # (Bt, H)
    e_cls = jnp.exp(s_cls - m)                                          # (Bt, H)
    e_x = jnp.exp(s_x - m[:, None, :])                                  # (Bt, T, H)
    denom = e_cls + jnp.sum(e_x, axis=1)                                # (Bt, H)
    inv = pl.reciprocal(denom, approx=True)                             # (Bt, H)  EUP

    # Expand per-head weights back to E lanes (G^T) and take the weighted V sum.
    w_cls = jnp.dot(e_cls, GT, preferred_element_type=jnp.float32)      # (Bt, E)
    w_x = jnp.dot(e_x.reshape(Bt * T, H), GT,
                  preferred_element_type=jnp.float32).reshape(Bt, T, E)
    raw = w_cls * v_cls + jnp.sum(w_x * v_x, axis=1)                    # (Bt, E)
    inv_full = jnp.dot(inv, GT, preferred_element_type=jnp.float32)     # (Bt, E)
    out_ref[...] = (raw * inv_full).astype(out_ref.dtype)


def attention_pooling(x, params, num_heads, *, block_bs=8,
                      matmul_dtype=jnp.bfloat16):
    """Pallas forward of AttentionPooling: x (B, T, E) -> (B, E)."""
    bs, T, E = x.shape
    d = E // num_heads
    inv_sqrt_d = 1.0 / math.sqrt(d)      # == (1/sqrt(sqrt(d)))**2, folded once

    # ---- Host-side constant folding (all exact in f32) ----------------------
    # Fold the 1/sqrt(d) score scale into the Q projection, and fold the
    # positional embedding's contribution into the Q / KV biases (linearity).
    wq = (params["Wq"] * inv_sqrt_d).astype(matmul_dtype)               # (E, E)
    bq_eff = ((params["pos"] @ params["Wq"]) + params["bq"]) * inv_sqrt_d  # (1, E)
    wkv_f32 = jnp.concatenate([params["Wk"], params["Wv"]], axis=1)     # (E, 2E)
    bkv = jnp.concatenate([params["bk"], params["bv"]], axis=1)         # (1, 2E)
    pos_kv = params["pos"] @ wkv_f32                                    # (1, 2E)
    wkv = wkv_f32.astype(matmul_dtype)

    # One-hot head-grouping matrices (lane-dense head split / merge).
    head_ids = jnp.arange(E, dtype=jnp.int32) // d
    G = jax.nn.one_hot(head_ids, num_heads, dtype=jnp.float32)          # (E, H)
    GT = jnp.transpose(G)                                               # (H, E)

    # ---- Batch tiling --------------------------------------------------------
    Bt = max(1, min(block_bs, bs))
    pad = (-bs) % Bt
    x_p = jnp.pad(x, ((0, pad), (0, 0), (0, 0))) if pad else x
    Bp = bs + pad
    # TODO(synk): for real model sizes pad E up to a multiple of 128 (lane
    # width) in the wrapper; the small test config (E=32) runs masked.

    out = pl.pallas_call(
        attention_pooling_kernel,
        out_shape=jax.ShapeDtypeStruct((Bp, E), jnp.float32),
        grid_spec=pltpu.PrefetchScalarGridSpec(
            num_scalar_prefetch=0,
            grid=(Bp // Bt,),
            in_specs=[
                # Batch tile of the sequence — only per-step DMA'd operand.
                pl.BlockSpec((Bt, T, E), lambda b: (b, 0, 0)),
                # Weights / constants: whole-array VMEM-resident,
                # single-buffered (constant across the grid).
                pl.BlockSpec(memory_space=pltpu.MemorySpace.VMEM),      # Wq (scaled)
                pl.BlockSpec(memory_space=pltpu.MemorySpace.VMEM),      # bq_eff
                pl.BlockSpec(memory_space=pltpu.MemorySpace.VMEM),      # Wkv fused
                pl.BlockSpec(memory_space=pltpu.MemorySpace.VMEM),      # bkv fused
                pl.BlockSpec(memory_space=pltpu.MemorySpace.VMEM),      # pos @ Wkv
                pl.BlockSpec(memory_space=pltpu.MemorySpace.VMEM),      # G
                pl.BlockSpec(memory_space=pltpu.MemorySpace.VMEM),      # G^T
            ],
            # Lane-dense 2-D output block.
            out_specs=pl.BlockSpec((Bt, E), lambda b: (b, 0)),
        ),
        compiler_params=pltpu.CompilerParams(
            dimension_semantics=("parallel",),        # batch tiles independent
            vmem_limit_bytes=32 * 1024 * 1024,        # explicit budget (≤ all gens)
        ),
    )(x_p, wq, bq_eff, wkv, bkv, pos_kv, G, GT)
    return out[:bs]


# ----------------------------------------------------------------------------
# Pure-JAX reference (faithful to the PyTorch forward)
# ----------------------------------------------------------------------------
def attention_pooling_reference(x, params, num_heads):
    bs, T, E = x.shape
    d = E // num_heads
    scale = 1.0 / math.sqrt(math.sqrt(d))
    hi = jax.lax.Precision.HIGHEST

    cls = jnp.mean(x, axis=1, keepdims=True) + params["pos"]          # (B,1,E)
    xcat = jnp.concatenate([cls, x], axis=1)                          # (B,S,E)
    q = jnp.matmul(cls, params["Wq"], precision=hi) + params["bq"]
    k = jnp.matmul(xcat, params["Wk"], precision=hi) + params["bk"]
    v = jnp.matmul(xcat, params["Wv"], precision=hi) + params["bv"]

    qh = q.reshape(bs, 1, num_heads, d)
    kh = k.reshape(bs, T + 1, num_heads, d)
    vh = v.reshape(bs, T + 1, num_heads, d)

    w = jnp.einsum("bqhd,bshd->bhqs", qh * scale, kh * scale, precision=hi)
    w = jax.nn.softmax(w, axis=-1)
    a = jnp.einsum("bhqs,bshd->bqhd", w, vh, precision=hi)            # (B,1,H,d)
    return a.reshape(bs, E)


# ----------------------------------------------------------------------------
# Deterministic synthetic parameters (weights stored in (in, out) layout)
# ----------------------------------------------------------------------------
def init_params(key, embed_dim):
    ks = jax.random.split(key, 7)
    s = 1.0 / math.sqrt(embed_dim)
    return {
        "pos": jax.random.normal(ks[0], (1, embed_dim), jnp.float32) * s,
        "Wq": s * jax.random.normal(ks[1], (embed_dim, embed_dim), jnp.float32),
        "bq": s * jax.random.normal(ks[2], (1, embed_dim), jnp.float32),
        "Wk": s * jax.random.normal(ks[3], (embed_dim, embed_dim), jnp.float32),
        "bk": s * jax.random.normal(ks[4], (1, embed_dim), jnp.float32),
        "Wv": s * jax.random.normal(ks[5], (embed_dim, embed_dim), jnp.float32),
        "bv": s * jax.random.normal(ks[6], (1, embed_dim), jnp.float32),
    }


if __name__ == "__main__":
    bs, seq, embed_dim, num_heads = 2, 8, 32, 4

    key = jax.random.PRNGKey(0)
    k_param, k_x = jax.random.split(key)
    params = init_params(k_param, embed_dim)
    x = jax.random.normal(k_x, (bs, seq, embed_dim), jnp.float32)

    out = jax.block_until_ready(attention_pooling(x, params, num_heads))
    ref = jax.block_until_ready(attention_pooling_reference(x, params, num_heads))

    assert out.shape == (bs, embed_dim), out.shape
    # Tolerance reflects mixed precision: bf16 MXU operands (f32 accumulation)
    # plus the approximate EUP reciprocal in the final softmax normalization.
    max_err = float(jnp.max(jnp.abs(out - ref)))
    assert jnp.allclose(out, ref, atol=3e-2, rtol=3e-2), max_err

    print("KERNEL_OK")
</pallas_src>

<mosaic_0001>
module attributes {stable_mosaic.version = 11 : i64} {
  func.func @attention_pooling_kernel(%arg0: i32, %arg1: memref<2x8x32xf32, #tpu.memory_space<vmem>>, %arg2: memref<32x32xbf16, #tpu.memory_space<vmem>>, %arg3: memref<1x32xf32, #tpu.memory_space<vmem>>, %arg4: memref<32x64xbf16, #tpu.memory_space<vmem>>, %arg5: memref<1x64xf32, #tpu.memory_space<vmem>>, %arg6: memref<1x64xf32, #tpu.memory_space<vmem>>, %arg7: memref<32x4xf32, #tpu.memory_space<vmem>>, %arg8: memref<4x32xf32, #tpu.memory_space<vmem>>, %arg9: memref<2x32xf32, #tpu.memory_space<vmem>>) attributes {dimension_semantics = [#tpu.dimension_semantics<parallel>], iteration_bounds = array<i64: 1>, scalar_prefetch = 0 : i64, scratch_operands = 0 : i64, tpu.core_type = #tpu.core_type<tc>, window_params = [{transform_indices = @transform_0, window_bounds = array<i64: 2, 8, 32>}, {pipeline_mode = #tpu.pipeline_mode<synchronous>, transform_indices = @transform_1, window_bounds = array<i64: 32, 32>}, {pipeline_mode = #tpu.pipeline_mode<synchronous>, transform_indices = @transform_2, window_bounds = array<i64: 1, 32>}, {pipeline_mode = #tpu.pipeline_mode<synchronous>, transform_indices = @transform_3, window_bounds = array<i64: 32, 64>}, {pipeline_mode = #tpu.pipeline_mode<synchronous>, transform_indices = @transform_4, window_bounds = array<i64: 1, 64>}, {pipeline_mode = #tpu.pipeline_mode<synchronous>, transform_indices = @transform_5, window_bounds = array<i64: 1, 64>}, {pipeline_mode = #tpu.pipeline_mode<synchronous>, transform_indices = @transform_6, window_bounds = array<i64: 32, 4>}, {pipeline_mode = #tpu.pipeline_mode<synchronous>, transform_indices = @transform_7, window_bounds = array<i64: 4, 32>}, {transform_indices = @transform_8, window_bounds = array<i64: 2, 32>}]} {
    %c0 = arith.constant 0 : index
    %c0_0 = arith.constant 0 : index
    %c0_1 = arith.constant 0 : index
    %0 = vector.load %arg1[%c0, %c0_0, %c0_1] : memref<2x8x32xf32, #tpu.memory_space<vmem>>, vector<2x8x32xf32>
    %1 = vector.shape_cast %0 : vector<2x8x32xf32> to vector<16x32xf32>
    %2 = arith.truncf %1 : vector<16x32xf32> to vector<16x32xbf16>
    %c0_2 = arith.constant 0 : index
    %c0_3 = arith.constant 0 : index
    %3 = vector.load %arg4[%c0_2, %c0_3] : memref<32x64xbf16, #tpu.memory_space<vmem>>, vector<32x64xbf16>
    %cst = arith.constant dense<0.000000e+00> : vector<16x64xf32>
    %4 = tpu.matmul %2, %3, %cst {dimension_numbers = #tpu.dot_dimension_numbers<[1], [0], [0], [1], [0, 0, 1, 1], [], []>} : vector<16x32xbf16>, vector<32x64xbf16>, vector<16x64xf32> -> vector<16x64xf32>
    %c0_4 = arith.constant 0 : index
    %c0_5 = arith.constant 0 : index
    %5 = vector.load %arg5[%c0_4, %c0_5] : memref<1x64xf32, #tpu.memory_space<vmem>>, vector<1x64xf32>
    %6 = vector.broadcast %5 : vector<1x64xf32> to vector<16x64xf32>
    %7 = arith.addf %4, %6 : vector<16x64xf32>
    %8 = vector.shape_cast %7 : vector<16x64xf32> to vector<2x8x64xf32>
    %cst_6 = arith.constant dense<0.000000e+00> : vector<2x64xf32>
    %9 = vector.multi_reduction <add>, %8, %cst_6 [1] : vector<2x8x64xf32> to vector<2x64xf32>
    %cst_7 = arith.constant 8.000000e+00 : f32
    %10 = vector.broadcast %cst_7 : f32 to vector<2x64xf32>
    %11 = arith.divf %9, %10 : vector<2x64xf32>
    %c0_8 = arith.constant 0 : index
    %c0_9 = arith.constant 0 : index
    %12 = vector.load %arg6[%c0_8, %c0_9] : memref<1x64xf32, #tpu.memory_space<vmem>>, vector<1x64xf32>
    %13 = vector.broadcast %12 : vector<1x64xf32> to vector<2x64xf32>
    %14 = arith.addf %11, %13 : vector<2x64xf32>
    %cst_10 = arith.constant dense<0.000000e+00> : vector<2x32xf32>
    %15 = vector.multi_reduction <add>, %0, %cst_10 [1] : vector<2x8x32xf32> to vector<2x32xf32>
    %cst_11 = arith.constant 8.000000e+00 : f32
    %16 = vector.broadcast %cst_11 : f32 to vector<2x32xf32>
    %17 = arith.divf %15, %16 : vector<2x32xf32>
    %18 = arith.truncf %17 : vector<2x32xf32> to vector<2x32xbf16>
    %c0_12 = arith.constant 0 : index
    %c0_13 = arith.constant 0 : index
    %19 = vector.load %arg2[%c0_12, %c0_13] : memref<32x32xbf16, #tpu.memory_space<vmem>>, vector<32x32xbf16>
    %cst_14 = arith.constant dense<0.000000e+00> : vector<2x32xf32>
    %20 = tpu.matmul %18, %19, %cst_14 {dimension_numbers = #tpu.dot_dimension_numbers<[1], [0], [0], [1], [0, 0, 1, 1], [], []>} : vector<2x32xbf16>, vector<32x32xbf16>, vector<2x32xf32> -> vector<2x32xf32>
    %c0_15 = arith.constant 0 : index
    %c0_16 = arith.constant 0 : index
    %21 = vector.load %arg3[%c0_15, %c0_16] : memref<1x32xf32, #tpu.memory_space<vmem>>, vector<1x32xf32>
    %22 = vector.broadcast %21 : vector<1x32xf32> to vector<2x32xf32>
    %23 = arith.addf %20, %22 : vector<2x32xf32>
    %24 = vector.extract_strided_slice %14 {offsets = [0, 0], sizes = [2, 32], strides = [1, 1]} : vector<2x64xf32> to vector<2x32xf32>
    %25 = vector.extract_strided_slice %14 {offsets = [0, 32], sizes = [2, 32], strides = [1, 1]} : vector<2x64xf32> to vector<2x32xf32>
    %26 = vector.extract_strided_slice %8 {offsets = [0, 0, 0], sizes = [2, 8, 32], strides = [1, 1, 1]} : vector<2x8x64xf32> to vector<2x8x32xf32>
    %27 = vector.extract_strided_slice %8 {offsets = [0, 0, 32], sizes = [2, 8, 32], strides = [1, 1, 1]} : vector<2x8x64xf32> to vector<2x8x32xf32>
    %c0_17 = arith.constant 0 : index
    %c0_18 = arith.constant 0 : index
    %28 = vector.load %arg7[%c0_17, %c0_18] : memref<32x4xf32, #tpu.memory_space<vmem>>, vector<32x4xf32>
    %c0_19 = arith.constant 0 : index
    %c0_20 = arith.constant 0 : index
    %29 = vector.load %arg8[%c0_19, %c0_20] : memref<4x32xf32, #tpu.memory_space<vmem>>, vector<4x32xf32>
    %30 = arith.mulf %23, %24 : vector<2x32xf32>
    %cst_21 = arith.constant dense<0.000000e+00> : vector<2x4xf32>
    %31 = tpu.matmul %30, %28, %cst_21 {dimension_numbers = #tpu.dot_dimension_numbers<[1], [0], [0], [1], [0, 0, 1, 1], [], []>} : vector<2x32xf32>, vector<32x4xf32>, vector<2x4xf32> -> vector<2x4xf32>
    %32 = vector.shape_cast %23 : vector<2x32xf32> to vector<2x1x32xf32>
    %33 = vector.broadcast %32 : vector<2x1x32xf32> to vector<2x8x32xf32>
    %34 = arith.mulf %33, %26 : vector<2x8x32xf32>
    %35 = vector.shape_cast %34 : vector<2x8x32xf32> to vector<16x32xf32>
    %cst_22 = arith.constant dense<0.000000e+00> : vector<16x4xf32>
    %36 = tpu.matmul %35, %28, %cst_22 {dimension_numbers = #tpu.dot_dimension_numbers<[1], [0], [0], [1], [0, 0, 1, 1], [], []>} : vector<16x32xf32>, vector<32x4xf32>, vector<16x4xf32> -> vector<16x4xf32>
    %37 = vector.shape_cast %36 : vector<16x4xf32> to vector<2x8x4xf32>
    %cst_23 = arith.constant dense<0xFF800000> : vector<2x4xf32>
    %38 = vector.multi_reduction <maximumf>, %37, %cst_23 [1] : vector<2x8x4xf32> to vector<2x4xf32>
    %39 = arith.maximumf %38, %31 : vector<2x4xf32>
    %40 = arith.subf %31, %39 : vector<2x4xf32>
    %41 = math.exp %40 : vector<2x4xf32>
    %42 = vector.shape_cast %39 : vector<2x4xf32> to vector<2x1x4xf32>
    %43 = vector.broadcast %42 : vector<2x1x4xf32> to vector<2x8x4xf32>
    %44 = arith.subf %37, %43 : vector<2x8x4xf32>
    %45 = math.exp %44 : vector<2x8x4xf32>
    %cst_24 = arith.constant dense<0.000000e+00> : vector<2x4xf32>
    %46 = vector.multi_reduction <add>, %45, %cst_24 [1] : vector<2x8x4xf32> to vector<2x4xf32>
    %47 = arith.addf %41, %46 : vector<2x4xf32>
    %48 = tpu.reciprocal %47 {approx = true} : vector<2x4xf32> -> vector<2x4xf32>
    %cst_25 = arith.constant dense<0.000000e+00> : vector<2x32xf32>
    %49 = tpu.matmul %41, %29, %cst_25 {dimension_numbers = #tpu.dot_dimension_numbers<[1], [0], [0], [1], [0, 0, 1, 1], [], []>} : vector<2x4xf32>, vector<4x32xf32>, vector<2x32xf32> -> vector<2x32xf32>
    %50 = vector.shape_cast %45 : vector<2x8x4xf32> to vector<16x4xf32>
    %cst_26 = arith.constant dense<0.000000e+00> : vector<16x32xf32>
    %51 = tpu.matmul %50, %29, %cst_26 {dimension_numbers = #tpu.dot_dimension_numbers<[1], [0], [0], [1], [0, 0, 1, 1], [], []>} : vector<16x4xf32>, vector<4x32xf32>, vector<16x32xf32> -> vector<16x32xf32>
    %52 = vector.shape_cast %51 : vector<16x32xf32> to vector<2x8x32xf32>
    %53 = arith.mulf %49, %25 : vector<2x32xf32>
    %54 = arith.mulf %52, %27 : vector<2x8x32xf32>
    %cst_27 = arith.constant dense<0.000000e+00> : vector<2x32xf32>
    %55 = vector.multi_reduction <add>, %54, %cst_27 [1] : vector<2x8x32xf32> to vector<2x32xf32>
    %56 = arith.addf %53, %55 : vector<2x32xf32>
    %cst_28 = arith.constant dense<0.000000e+00> : vector<2x32xf32>
    %57 = tpu.matmul %48, %29, %cst_28 {dimension_numbers = #tpu.dot_dimension_numbers<[1], [0], [0], [1], [0, 0, 1, 1], [], []>} : vector<2x4xf32>, vector<4x32xf32>, vector<2x32xf32> -> vector<2x32xf32>
    %58 = arith.mulf %56, %57 : vector<2x32xf32>
    %c0_29 = arith.constant 0 : index
    %c0_30 = arith.constant 0 : index
    %59 = vector.load %arg9[%c0_29, %c0_30] : memref<2x32xf32, #tpu.memory_space<vmem>>, vector<2x32xf32>
    tpu.vector_store %arg9[%c0_29, %c0_30], %58 {strides = array<i32>} : memref<2x32xf32, #tpu.memory_space<vmem>>, vector<2x32xf32>,
    return
  }
  func.func @transform_0(%arg0: i32) -> (i32, i32, i32) {
    %c0_i32 = arith.constant 0 : i32
    %c0_i32_0 = arith.constant 0 : i32
    %c0_i32_1 = arith.constant 0 : i32
    return %arg0, %c0_i32, %c0_i32_0 : i32, i32, i32
  }
  func.func @transform_1(%arg0: i32) -> (i32, i32) {
    %c0_i32 = arith.constant 0 : i32
    %c0_i32_0 = arith.constant 0 : i32
    %c0_i32_1 = arith.constant 0 : i32
    return %c0_i32, %c0_i32_0 : i32, i32
  }
  func.func @transform_2(%arg0: i32) -> (i32, i32) {
    %c0_i32 = arith.constant 0 : i32
    %c0_i32_0 = arith.constant 0 : i32
    %c0_i32_1 = arith.constant 0 : i32
    return %c0_i32, %c0_i32_0 : i32, i32
  }
  func.func @transform_3(%arg0: i32) -> (i32, i32) {
    %c0_i32 = arith.constant 0 : i32
    %c0_i32_0 = arith.constant 0 : i32
    %c0_i32_1 = arith.constant 0 : i32
    return %c0_i32, %c0_i32_0 : i32, i32
  }
  func.func @transform_4(%arg0: i32) -> (i32, i32) {
    %c0_i32 = arith.constant 0 : i32
    %c0_i32_0 = arith.constant 0 : i32
    %c0_i32_1 = arith.constant 0 : i32
    return %c0_i32, %c0_i32_0 : i32, i32
  }
  func.func @transform_5(%arg0: i32) -> (i32, i32) {
    %c0_i32 = arith.constant 0 : i32
    %c0_i32_0 = arith.constant 0 : i32
    %c0_i32_1 = arith.constant 0 : i32
    return %c0_i32, %c0_i32_0 : i32, i32
  }
  func.func @transform_6(%arg0: i32) -> (i32, i32) {
    %c0_i32 = arith.constant 0 : i32
    %c0_i32_0 = arith.constant 0 : i32
    %c0_i32_1 = arith.constant 0 : i32
    return %c0_i32, %c0_i32_0 : i32, i32
  }
  func.func @transform_7(%arg0: i32) -> (i32, i32) {
    %c0_i32 = arith.constant 0 : i32
    %c0_i32_0 = arith.constant 0 : i32
    %c0_i32_1 = arith.constant 0 : i32
    return %c0_i32, %c0_i32_0 : i32, i32
  }
  func.func @transform_8(%arg0: i32) -> (i32, i32) {
    %c0_i32 = arith.constant 0 : i32
    %c0_i32_0 = arith.constant 0 : i32
    return %arg0, %c0_i32 : i32, i32
  }
}

</mosaic_0001>

<bundles_post_ra>
// kernel: tpu_custom_call.1
= control target key start
LH: loop header
LB: loop body
LE: loop exit
PB: predicated region body
PF: predicated region fallthrough
CT: control target
= control target key end

     0   :  { %13 = vsyncpa [#allocation3], 0  ;;  %s1083_s0 = inlined_call_operand.vmem [shape: f32[2,8,32], index: 0, kind: input, shape index: {}]   ;;  %s1084_s1 = inlined_call_operand.vmem [shape: bf16[32,32], index: 1, kind: input, shape index: {}]   ;;  %s1085_s2 = inlined_call_operand.vmem [shape: f32[1,32], index: 2, kind: input, shape index: {}]   ;;  %s1086_s3 = inlined_call_operand.hbm [shape: bf16[32,64], index: 3, kind: input, shape index: {}]   ;;  %s1087_s4 = inlined_call_operand.vmem [shape: f32[1,64], index: 4, kind: input, shape index: {}]   ;;  %s1088_s5 = inlined_call_operand.vmem [shape: f32[1,64], index: 5, kind: input, shape index: {}]   ;;  %s1089_s6 = inlined_call_operand.vmem [shape: f32[32,4], index: 6, kind: input, shape index: {}]   ;;  %s1090_s7 = inlined_call_operand.vmem [shape: f32[4,32], index: 7, kind: input, shape index: {}]   ;;  %s1091_s8 = inlined_call_operand.hbm [shape: f32[2,32], index: 8, kind: output, shape index: {}]  }
   0x1   :  { %14 = vsyncpa [#allocation4], 0  ;;  %s939_s27 = smov [#allocation2]  }
   0x2   :  { %s26_s28 = sshll.u32 %s939_s27, 4  ;;  %s27_s28 = int_to_ptr.vmem [resolvable:$true] %s26_s28 }
   0x3   :  { %s903_s29 = scalar_lea.vmem %s27_s28, 256  ;;  %p908_p1 = scmp.lt.s32.totalorder %s27_s28, %s27_s28 }
   0x4   :  { %p904_p0 = scmp.ne.s32.totalorder %s27_s28, %s903_s29  ;;  %p909_p2 = scmp.lt.s32.totalorder %s903_s29, %s903_s29 }
   0x6   :  { %p910_p3 = por %p909_p2, %p908_p1 }
   0x8   :  { %p911_p4 = pnand %p910_p3, %p904_p0 }
   0xa   :  { %914 = shalt.err (!%p911_p4)
}
   0xb   :  { %s940_s30 = smov 64   ;;  %s941_s9 = smov 4  }
   0xc   :  { %32 = dma.hbm_to_vmem [thread:$0]  %s1086_s3, 256, %s27_s28, [#allocation3], %s940_s30, %s940_s30, %s941_s9  }
   0xd   :  { %935 = dma.done.wait [#allocation3], 256  }
   0xe   :  { %936 = vsyncadd [#allocation3], 4294967040  ;;  %v942_v0 = vmov 0.0   ;;  %vm943_vm0 = vmmov 0   ;;  %v883_v1 = vld [vmem:[#allocation2 + $0x8] sm:$0xff]   ;;  %vm71_vm1 = vcmask 261120   ;;  %v322_v47 = vlaneseq }
   0xf   :  { %822 = vmatprep.subr.bf16.mxu0 %v942_v0  ;;  %826 = vmatprep.mubr.msk.bf16.mxu0 %vm943_vm0, %v942_v0  ;;  %v884_v2 = vld [vmem:[#allocation2] sm:$0xff]   ;;  %v46_v4 = vld [vmem:[%s1083_s0 + $0x8] sm:$0xff]  ;;  %vm176_vm2 = vcmask 1041409   ;;  %v237_v30 = vld [vmem:[%s1089_s6 + $0x18] sm:$0xff]  ;;  %vm116_vm3 = vcmask 523264   ;;  %s944_s27 = smov 96  }
  0x10   :  { %830 = vmatprep.subr.bf16.mxu1 %v942_v0  ;;  %834 = vmatprep.mubr.msk.bf16.mxu1 %vm943_vm0, %v942_v0  ;;  %v45_v3 = vld [vmem:[%s1083_s0] sm:$0xff]  ;;  %v150_v6 = vsel %vm71_vm1, %v46_v4, 0.0  ;;  %v885_v7 = vld [vmem:[%s1084_s1 + $0x8] sm:$0xff]   ;;  %v236_v31 = vld [vmem:[%s1089_s6 + $0x10] sm:$0xff]  ;;  %v945_v45 = vmov 1966171168  }
  0x11   :  { %823 = vmatpush3.bf16.msra.mxu0 %v883_v1  ;;  %v143_v5 = vsel %vm71_vm1, %v45_v3, 0.0  ;;  %v151_v9 = vrot.slane %v150_v6, 4  ;;  %v47_v10 = vpack.c.bf16 %v46_v4, %v45_v3  ;;  %831 = vmatpush3.bf16.msra.mxu1 %v885_v7  ;;  %v886_v11 = vld [vmem:[%s1084_s1] sm:$0xff]   ;;  %v235_v32 = vld [vmem:[%s1089_s6 + $0x8] sm:$0xff]  ;;  %v320_v46 = vunpack.c.l.s4 %v945_v45 }
  0x12   :  { %824 = vmatprep.subr.bf16.mxu0 %v942_v0  ;;  %v144_v8 = vrot.slane %v143_v5, 4  ;;  %832 = vmatprep.subr.bf16.mxu1 %v942_v0  ;;  %v234_v33 = vld [vmem:[%s1089_s6] sm:$0xff]  ;;  %v323_v53 = vshrl.u32 %v322_v47, 7  ;;  %vm500_vm4 = vcmask 1043456   ;;  %vm434_vm5 = vcmask 31744  }
  0x13   :  { %v152_v13 = vadd.f32 %v151_v9, %v150_v6  ;;  %v779_v34 = vld [vmem:[%s1087_s4] ss:$0 sm:$0xff]  ;;  %v321_v52 = vunpack.c.0.s8 %v320_v46  ;;  %vm762_vm6 = vcmask 254976  }
  0x14   :  { %v145_v12 = vadd.f32 %v144_v8, %v143_v5  ;;  %v784_v57 = vld [vmem:[%s1085_s2] ss:$0 sm:$0xff]  ;;  %v343_v4 = vsub.s32 0, %v323_v53 }
  0x15   :  { %825 = vmatpush3.bf16.msra.mxu0 %v884_v2  ;;  %v153_v15 = vrot.slane %v152_v13, 2  ;;  %833 = vmatpush3.bf16.msra.mxu1 %v886_v11  ;;  %v324_v59 = vsub.s32 %v321_v52, %v323_v53  ;;  %v783_v5 = vld [vmem:[%s1088_s5] ss:$0 sm:$0xff] }
  0x16   :  { %838 = vmatprep.subr.mxu0 %v942_v0  ;;  %v146_v14 = vrot.slane %v145_v12, 2  ;;  %849 = vmatprep.subr.mxu1 %v237_v30 }
  0x17   :  { %v154_v17 = vadd.f32 %v153_v15, %v152_v13 }
  0x18   :  { %827 = vmatmul.mubr.msk.bf16.vlgmr.msra.gmra.mxu0 %vm71_vm1, %v47_v10  ;;  %v147_v16 = vadd.f32 %v146_v14, %v145_v12 }
  0x19   :  { %846 = vmatprep.mubr.msk.f32.mxu0 %vm943_vm0, %v942_v0  ;;  %v155_v19 = vrot.slane %v154_v17, 1  ;;  %839 = vmatpush3.msra.mxu0 %v237_v30 }
  0x1a   :  { %v148_v18 = vrot.slane %v147_v16, 1  ;;  %840 = vmatprep.subr.mxu0 %v942_v0 }
  0x1b   :  { %v156_v21 = vadd.f32 %v155_v19, %v154_v17  ;;  %841 = vmatpush3.msra.mxu0 %v236_v31 }
  0x1c   :  { %v149_v20 = vadd.f32 %v148_v18, %v147_v16  ;;  %842 = vmatprep.subr.mxu0 %v942_v0 }
  0x1d   :  { %v158_v23 = vmul.f32 0.125, %v156_v21  ;;  %843 = vmatpush3.msra.mxu0 %v235_v32  ;;  %v238_v21 = vld [vmem:[%s1090_s7] sm:$0xf]  ;;  %s946_s7 = smov [#allocation5]  }
  0x1e   :  { %v157_v22 = vmul.f32 0.125, %v149_v20  ;;  %844 = vmatprep.subr.mxu0 %v942_v0  ;;  %s770_s30 = sshll.u32 %s946_s7, 4  ;;  %s771_s30 = int_to_ptr.vmem [resolvable:$true] %s770_s30 }
  0x1f   :  { %v160_v25 = vpack.c.bf16 %v158_v23, %v158_v23  ;;  %845 = vmatpush3.msra.mxu0 %v234_v33  ;;  %s915_s9 = scalar_lea.vmem %s771_s30, 32  ;;  %p920_p6 = scmp.lt.s32.totalorder %s771_s30, %s771_s30 }
  0x20   :  { %v159_v24 = vpack.c.bf16 %v157_v22, %v157_v22  ;;  %860 = vmatprep.subr.mxu0 %v942_v0  ;;  %p916_p5 = scmp.ne.s32.totalorder %s771_s30, %s915_s9  ;;  %p921_p7 = scmp.lt.s32.totalorder %s915_s9, %s915_s9 }
  0x21   :  { %v175_v27 = vunpack.c.l.b16 %v160_v25 }
  0x22   :  { %v174_v26 = vunpack.c.l.b16 %v159_v24  ;;  %p922_p8 = por %p921_p7, %p920_p6 }
  0x24   :  { %v177_v28 = vsel %vm176_vm2, %v175_v27, %v174_v26  ;;  %p923_p9 = pnand %p922_p8, %p916_p5 }
  0x25   :  { %v178_v29 = vpack.c.b16 %v177_v28, %v177_v28 }
  0x27   :  { %835 = vmatmul.mubr.msk.bf16.vlgmr.msra.gmra.mxu1 %vm71_vm1, %v178_v29 }
  0x28   :  { %850 = vmatpush3.msra.mxu1 %v237_v30 }
  0x29   :  { %851 = vmatprep.subr.mxu1 %v236_v31 }
  0x2a   :  { %852 = vmatpush3.msra.mxu1 %v236_v31 }
  0x2b   :  { %853 = vmatprep.subr.mxu1 %v235_v32 }
  0x2c   :  { %854 = vmatpush3.msra.mxu1 %v235_v32 }
  0x2d   :  { %855 = vmatprep.subr.mxu1 %v234_v33 }
  0x2e   :  { %856 = vmatpush3.msra.mxu1 %v234_v33 }
  0x2f   :  { %865 = vmatprep.subr.msk.mxu1 %vm500_vm4, %v238_v21 }
  0xd8   :  { %v109_v35 = vpop.f32.mrf.mxu0 }
  0xd9   :  { %v110_v36 = vadd.f32 %v779_v34, %v109_v35 }
  0xda   :  { %v828_v37 = vpop.f32.mrf.mxu0 }
  0xdb   :  { %v117_v38 = vsel %vm116_vm3, %v110_v36, 0.0  ;;  %661 = vrot.lane.b32.xlu0 %v110_v36, %s944_s27 }
  0xdc   :  { %v118_v39 = vrot.slane %v117_v38, 4  ;;  %v112_v40 = vpop.f32.mrf.mxu0 }
  0xdd   :  { %v113_v41 = vadd.f32 %v779_v34, %v112_v40 }
  0xde   :  { %v119_v42 = vadd.f32 %v118_v39, %v117_v38  ;;  %v829_v43 = vpop.f32.mrf.mxu0 }
  0xdf   :  { %v124_v44 = vsel %vm116_vm3, %v113_v41, 0.0  ;;  %663 = vrot.lane.b32.xlu0 %v113_v41, %s944_s27 }
  0xe0   :  { %v120_v48 = vrot.slane %v119_v42, 2  ;;  %v125_v49 = vrot.slane %v124_v44, 4 }
  0xe2   :  { %v121_v50 = vadd.f32 %v120_v48, %v119_v42  ;;  %v126_v51 = vadd.f32 %v125_v49, %v124_v44 }
  0xe4   :  { %v127_v54 = vrot.slane %v126_v51, 2  ;;  %v122_v55 = vrot.slane %v121_v50, 1 }
  0xe6   :  { %v128_v56 = vadd.f32 %v127_v54, %v126_v51  ;;  %v123_v58 = vadd.f32 %v122_v55, %v121_v50 }
  0xe7   :  { %v228_v60 = vpop.f32.mrf.mxu1 }
  0xe8   :  { %v129_v61 = vrot.slane %v128_v56, 1  ;;  %v229_v62 = vadd.f32 %v784_v57, %v228_v60  ;;  %v132_v2 = vmul.f32 0.125, %v123_v58 }
  0xe9   :  { %v836_v63 = vpop.f32.mrf.mxu1 }
  0xea   :  { %v130_v1 = vadd.f32 %v129_v61, %v128_v56  ;;  %v325_v3 = vrot.slane %v229_v62, %v324_v59  ;;  %v141_v11 = vadd.f32 %v783_v5, %v132_v2 }
  0xeb   :  { %v231_v6 = vpop.f32.mrf.mxu1 }
  0xec   :  { %v133_v7 = vmul.f32 0.125, %v130_v1  ;;  %v326_v8 = vcombine.high %v325_v3, %v325_v3  ;;  %v333_v9 = vrot.slane %v325_v3, %v324_v59 }
  0xed   :  { %v837_v10 = vpop.f32.mrf.mxu1 }
  0xee   :  { %v142_v12 = vadd.f32 %v783_v5, %v133_v7  ;;  %v340_v13 = vrot.slane %v326_v8, %v324_v59  ;;  %v344_v14 = vrot.slane %v333_v9, %v343_v4 }
  0xf0   :  { %v241_v15 = vrot.slane %v142_v12, 7  ;;  %v348_v16 = vrot.slane %v340_v13, %v343_v4  ;;  %v351_v17 = vmul.f32 %v344_v14, %v110_v36 }
  0xf2   :  { %v242_v18 = vsel %vm176_vm2, %v241_v15, %v141_v11  ;;  %v352_v19 = vmul.f32 %v348_v16, %v113_v41  ;;  %857 = vmatprep.mubr.msk.f32.mxu1 %vm71_vm1, %v351_v17 }
  0xf3   :  { %655 = vrot.lane.b32.xlu1 %v242_v18, %s944_s27  ;;  %v244_v20 = vmul.f32 %v242_v18, %v229_v62 }
  0xf4   :  { %858 = vmatmul.mubr.msk.f32.vlgmr.msra.gmra.mxu1 %vm71_vm1, %v352_v19 }
  0xf5   :  { %847 = vmatmul.mubr.msk.f32.vlgmr.msra.gmra.mxu0 %vm71_vm1, %v244_v20  ;;  %866 = vmatpush3.msk.msra.mxu1 %vm500_vm4, %v238_v21 }
  0xf6   :  { %862 = vmatprep.mubr.msk.f32.mxu0 %vm943_vm0, %v942_v0  ;;  %861 = vmatpush3.msk.msra.mxu0 %vm500_vm4, %v238_v21 }
  0xf7   :  { %870 = vmatprep.subr.mxu0 %v942_v0 }
 0x14d   :  { %v662_v10 = vpop.permute.xlu0 %661 }
 0x151   :  { %v664_v12 = vpop.permute.xlu0 %663 }
 0x1b4   :  { %v859_v22 = vpop.f32.mrf.mxu1 }
 0x1b5   :  { %v314_v23 = vpop.f32.mrf.mxu0  ;;  %v442_v24 = vsel %vm434_vm5, %v859_v22, -inf }
 0x1b6   :  { %v443_v25 = vrot.slane %v442_v24, 4  ;;  %v425_v26 = vpop.f32.mrf.mxu1  ;;  %v450_v39 = vrot.slane %v314_v23, 1 }
 0x1b7   :  { %v848_v27 = vpop.f32.mrf.mxu0  ;;  %v435_v28 = vsel %vm434_vm5, %v425_v26, -inf }
 0x1b8   :  { %v444_v29 = vmax.f32 %v442_v24, %v443_v25  ;;  %v436_v30 = vrot.slane %v435_v28, 4 }
 0x1ba   :  { %v445_v31 = vrot.slane %v444_v29, 2  ;;  %v437_v32 = vmax.f32 %v435_v28, %v436_v30 }
 0x1bc   :  { %v446_v33 = vmax.f32 %v444_v29, %v445_v31  ;;  %v438_v34 = vrot.slane %v437_v32, 2  ;;  %v656_v31 = vpop.permute.xlu1 %655 }
 0x1be   :  { %v447_v35 = vrot.slane %v446_v33, 1  ;;  %v439_v36 = vmax.f32 %v437_v32, %v438_v34 }
 0x1c0   :  { %v448_v37 = vmax.f32 %v446_v33, %v447_v35  ;;  %v440_v38 = vrot.slane %v439_v36, 1 }
 0x1c2   :  { %v441_v40 = vmax.f32 %v439_v36, %v440_v38  ;;  %v454_v41 = vmax.f32 %v448_v37, %v450_v39 }
 0x1c4   :  { %v453_v42 = vmax.f32 %v441_v40, %v314_v23  ;;  %v457_v43 = vrot.slane %v454_v41, 7  ;;  %v470_v44 = vrot.slane %v454_v41, %v343_v4 }
 0x1c6   :  { %v458_v45 = vsel %vm176_vm2, %v457_v43, %v453_v42  ;;  %v466_v46 = vrot.slane %v453_v42, %v343_v4  ;;  %v472_v47 = vsub.f32 %v859_v22, %v470_v44 }
 0x1c7   :  { %v460_v48 = vsub.f32 %v314_v23, %v458_v45 }
 0x1c8   :  { %v471_v49 = vsub.f32 %v425_v26, %v466_v46  ;;  %v475_v50 = vmul.f32 1.442695, %v472_v47 }
 0x1c9   :  { %v461_v51 = vmul.f32 1.442695, %v460_v48 }
 0x1ca   :  { %v473_v52 = vmul.f32 1.442695, %v471_v49  ;;  %887 = vpow2.f32 %v475_v50 }
 0x1cb   :  { %889 = vpow2.f32 %v461_v51 }
 0x1cc   :  { %891 = vpow2.f32 %v473_v52 }
 0x1d7   :  { %v888_v53 = vpop.eup %887 }
 0x1d8   :  { %v890_v54 = vpop.eup %889  ;;  %v484_v55 = vsel %vm434_vm5, %v888_v53, 0.0 }
 0x1d9   :  { %v892_v56 = vpop.eup %891  ;;  %v485_v57 = vrot.slane %v484_v55, 4  ;;  %863 = vmatmul.mubr.msk.f32.vlgmr.msra.gmra.mxu0 %vm434_vm5, %v890_v54 }
 0x1da   :  { %v477_v58 = vsel %vm434_vm5, %v892_v56, 0.0  ;;  %867 = vmatprep.mubr.msk.f32.mxu1 %vm434_vm5, %v892_v56  ;;  %871 = vmatpush3.msk.msra.mxu0 %vm500_vm4, %v238_v21 }
 0x1db   :  { %v478_v59 = vrot.slane %v477_v58, 4  ;;  %v486_v60 = vadd.f32 %v485_v57, %v484_v55  ;;  %868 = vmatmul.mubr.msk.f32.vlgmr.msra.gmra.mxu1 %vm434_vm5, %v888_v53  ;;  %872 = vmatprep.mubr.msk.f32.mxu0 %vm943_vm0, %v942_v0 }
 0x1dd   :  { %v479_v61 = vadd.f32 %v478_v59, %v477_v58  ;;  %v487_v62 = vrot.slane %v486_v60, 2 }
 0x1df   :  { %v480_v63 = vrot.slane %v479_v61, 2  ;;  %v488_v1 = vadd.f32 %v487_v62, %v486_v60 }
 0x1e1   :  { %v481_v2 = vadd.f32 %v480_v63, %v479_v61  ;;  %v489_v3 = vrot.slane %v488_v1, 1 }
 0x1e3   :  { %v482_v4 = vrot.slane %v481_v2, 1  ;;  %v490_v6 = vadd.f32 %v489_v3, %v488_v1 }
 0x1e5   :  { %v483_v5 = vadd.f32 %v482_v4, %v481_v2 }
 0x1e7   :  { %v493_v7 = vsel %vm176_vm2, %v490_v6, %v483_v5 }
 0x1e8   :  { %v495_v8 = vadd.f32 %v890_v54, %v493_v7 }
 0x1ea   :  { %893 = vrcp.f32 %v495_v8 }
 0x1f7   :  { %v894_v9 = vpop.eup %893 }
 0x1f8   :  { %873 = vmatmul.mubr.msk.f32.vlgmr.msra.gmra.mxu0 %vm434_vm5, %v894_v9 }
 0x299   :  { %v570_v11 = vpop.f32.mrf.mxu0 }
 0x29a   :  { %v658_v33 = vmul.f32 %v656_v31, %v570_v11 }
 0x29b   :  { %v864_v0 = vpop.f32.mrf.mxu0  ;;  %v869_v13 = vpop.f32.mrf.mxu1 }
 0x29c   :  { %v668_v14 = vmul.f32 %v869_v13, %v664_v12 }
 0x29d   :  { %v646_v15 = vpop.f32.mrf.mxu1 }
 0x29e   :  { %v676_v16 = vsel %vm71_vm1, %v668_v14, 0.0  ;;  %v667_v17 = vmul.f32 %v662_v10, %v646_v15 }
 0x29f   :  { %v677_v18 = vrot.slane %v676_v16, 4 }
 0x2a0   :  { %v669_v19 = vsel %vm71_vm1, %v667_v17, 0.0 }
 0x2a1   :  { %v670_v20 = vrot.slane %v669_v19, 4  ;;  %v678_v21 = vadd.f32 %v677_v18, %v676_v16 }
 0x2a3   :  { %v671_v22 = vadd.f32 %v670_v20, %v669_v19  ;;  %v679_v24 = vrot.slane %v678_v21, 2 }
 0x2a5   :  { %v672_v23 = vrot.slane %v671_v22, 2  ;;  %v680_v26 = vadd.f32 %v679_v24, %v678_v21 }
 0x2a7   :  { %v673_v25 = vadd.f32 %v672_v23, %v671_v22  ;;  %v681_v28 = vrot.slane %v680_v26, 1 }
 0x2a9   :  { %v674_v27 = vrot.slane %v673_v25, 1  ;;  %v682_v30 = vadd.f32 %v681_v28, %v680_v26 }
 0x2ab   :  { %v675_v29 = vadd.f32 %v674_v27, %v673_v25 }
 0x2ad   :  { %v685_v32 = vsel %vm176_vm2, %v682_v30, %v675_v29 }
 0x2ae   :  { %v687_v34 = vadd.f32 %v685_v32, %v658_v33 }
 0x2b8   :  { %v757_v35 = vpop.f32.mrf.mxu0 }
 0x2b9   :  { %v761_v36 = vmul.f32 %v757_v35, %v687_v34 }
 0x2ba   :  { %v874_v37 = vpop.f32.mrf.mxu0 }
 0x2bb   :  { %763 = vst.msk [vmem:[#allocation5] sm:$0x3] %vm762_vm6, %v761_v36 }
 0x2bc   :  { %926 = shalt.err (!%p923_p9)
}
 0x2bd   :  { %773 = dma.vmem_to_hbm [thread:$0]  %s771_s30, 32, %s1091_s8, [#allocation4]  }
 0x2be   :  { %937 = dma.done.wait [#allocation4], 32  }
 0x2bf   :  { %938 = vsyncadd [#allocation4], 4294967264 }
 0x2c0   :  { %777 = vsyncpa [#allocation3], 1 }
 0x2c1   :  { %778 = vsyncpa [#allocation4], 1 }

</bundles_post_ra>
